<compile_context>
chip_gen: v6e
topology: v6e:2x2x1
jax: 0.10.0
libtpu: 0.0.40
codegen_flags: <defaults>
</compile_context>

<pallas_src>
import jax
import jax.numpy as jnp
from jax.experimental import pallas as pl
from jax.experimental.pallas import tpu as pltpu


def _round_up(n, m):
    return ((n + m - 1) // m) * m


def attribute_group_kernel(x_ref, w1_ref, b1_ref, w2_ref, b2_ref, o_ref):
    """Fused: out = relu(x @ W1 + b1) @ W2 + b2 for one batch tile."""
    # First linear (MXU) with f32 accumulation.
    h = jnp.dot(x_ref[...], w1_ref[...], preferred_element_type=jnp.float32)
    # Bias + ReLU in f32 on the VPU (safe on v5e: no bf16 elementwise needed).
    h = jnp.maximum(h + b1_ref[...], 0.0)
    # Dropout -> identity at inference.
    # Second linear (MXU); explicit cast of the f32 accumulator down to the
    # weight dtype (bf16 when compute_dtype=bf16) is an intentional
    # inference-time choice.
    out = jnp.dot(h.astype(w2_ref.dtype), w2_ref[...],
                  preferred_element_type=jnp.float32)
    out = out + b2_ref[...]
    o_ref[...] = out.astype(o_ref.dtype)


def attribute_group_forward(x, w1, b1, w2, b2, *, block_batch=None,
                            compute_dtype=None):
    """x: [B, in_features] -> [B, num_attributes].

    w1: [in_features, 1024], b1: [1, 1024],
    w2: [1024, num_attributes], b2: [1, num_attributes]  (pre-transposed).
    """
    B, in_features = x.shape
    hidden = w1.shape[1]
    num_attr = w2.shape[1]
    assert w1.shape == (in_features, hidden)
    assert b1.shape == (1, hidden)
    assert w2.shape == (hidden, num_attr)
    assert b2.shape == (1, num_attr)

    out_dtype = x.dtype
    if compute_dtype is None:
        compute_dtype = x.dtype

    # Batch tile: multiple of 8 (f32 sublane), big enough to feed the MXU,
    # whole batch per grid step when the batch is small.
    if block_batch is None:
        block_batch = min(256, _round_up(B, 8))
    block_batch = max(8, _round_up(block_batch, 8))
    B_pad = _round_up(B, block_batch)

    # Lane-dense output: pad the attribute dim to a multiple of 128.
    num_attr_pad = _round_up(num_attr, 128)

    # Wrapper-side padding / casting (done once per call, outside the kernel).
    x_p = x
    if B_pad != B:
        x_p = jnp.pad(x_p, ((0, B_pad - B), (0, 0)))
    x_p = x_p.astype(compute_dtype)

    w1_c = w1.astype(compute_dtype)

    w2_p, b2_p = w2, b2
    if num_attr_pad != num_attr:
        w2_p = jnp.pad(w2_p, ((0, 0), (0, num_attr_pad - num_attr)))
        b2_p = jnp.pad(b2_p, ((0, 0), (0, num_attr_pad - num_attr)))
    w2_c = w2_p.astype(compute_dtype)

    # Biases stay f32 (bias-add / ReLU run in f32 inside the kernel).
    b1_f = b1.astype(jnp.float32)
    b2_f = b2_p.astype(jnp.float32)

    grid = (B_pad // block_batch,)

    out_p = pl.pallas_call(
        attribute_group_kernel,
        out_shape=jax.ShapeDtypeStruct((B_pad, num_attr_pad), out_dtype),
        grid_spec=pltpu.PrefetchScalarGridSpec(
            num_scalar_prefetch=0,
            grid=grid,
            in_specs=[
                # batch tile of the input
                pl.BlockSpec((block_batch, in_features), lambda i: (i, 0)),
                # weights / biases: full arrays, same block every step
                pl.BlockSpec((in_features, hidden), lambda i: (0, 0)),
                pl.BlockSpec((1, hidden), lambda i: (0, 0)),
                pl.BlockSpec((hidden, num_attr_pad), lambda i: (0, 0)),
                pl.BlockSpec((1, num_attr_pad), lambda i: (0, 0)),
            ],
            out_specs=pl.BlockSpec((block_batch, num_attr_pad),
                                   lambda i: (i, 0)),
        ),
        compiler_params=pltpu.CompilerParams(
            dimension_semantics=("parallel",)),
    )(x_p, w1_c, b1_f, w2_c, b2_f)

    # Strip batch / attribute padding.
    return out_p[:B, :num_attr]


def init_params(key, in_features, num_attributes, hidden=1024,
                dtype=jnp.float32):
    """Deterministic init matching nn.Linear shapes (weights pre-transposed)."""
    k1, k2, k3, k4 = jax.random.split(key, 4)
    s1 = 1.0 / jnp.sqrt(in_features)
    s2 = 1.0 / jnp.sqrt(hidden)
    w1 = jax.random.uniform(k1, (in_features, hidden), dtype, -s1, s1)
    b1 = jax.random.uniform(k2, (1, hidden), dtype, -s1, s1)
    w2 = jax.random.uniform(k3, (hidden, num_attributes), dtype, -s2, s2)
    b2 = jax.random.uniform(k4, (1, num_attributes), dtype, -s2, s2)
    return w1, b1, w2, b2


if __name__ == "__main__":
    key = jax.random.PRNGKey(0)
    kx, kx2, kp = jax.random.split(key, 3)

    in_features = 256
    num_attributes = 16
    w1, b1, w2, b2 = init_params(kp, in_features, num_attributes)

    # --- f32 path, batch divisible by 8 ---
    batch = 8
    x = jax.random.normal(kx, (batch, in_features), jnp.float32)
    out = attribute_group_forward(x, w1, b1, w2, b2)
    out = jax.block_until_ready(out)
    ref = jnp.maximum(x @ w1 + b1, 0.0) @ w2 + b2
    assert out.shape == (batch, num_attributes)
    assert jnp.allclose(out, ref, atol=1e-4, rtol=1e-4)

    # --- bf16-matmul path, ragged batch (exercises padding + casts) ---
    batch2 = 10
    x2 = jax.random.normal(kx2, (batch2, in_features), jnp.float32)
    out2 = attribute_group_forward(x2, w1, b1, w2, b2,
                                   compute_dtype=jnp.bfloat16)
    out2 = jax.block_until_ready(out2)
    ref2 = jnp.maximum(x2 @ w1 + b1, 0.0) @ w2 + b2
    assert out2.shape == (batch2, num_attributes)
    assert jnp.allclose(out2, ref2, atol=1e-1, rtol=1e-1)

    print("KERNEL_OK")
</pallas_src>

<mosaic_0001>
module attributes {stable_mosaic.version = 11 : i64} {
  func.func @attribute_group_kernel(%arg0: i32, %arg1: memref<8x256xf32, #tpu.memory_space<vmem>>, %arg2: memref<256x1024xf32, #tpu.memory_space<vmem>>, %arg3: memref<1x1024xf32, #tpu.memory_space<vmem>>, %arg4: memref<1024x128xf32, #tpu.memory_space<vmem>>, %arg5: memref<1x128xf32, #tpu.memory_space<vmem>>, %arg6: memref<8x128xf32, #tpu.memory_space<vmem>>) attributes {dimension_semantics = [#tpu.dimension_semantics<parallel>], iteration_bounds = array<i64: 1>, scalar_prefetch = 0 : i64, scratch_operands = 0 : i64, tpu.core_type = #tpu.core_type<tc>, window_params = [{transform_indices = @transform_0, window_bounds = array<i64: 8, 256>}, {pipeline_mode = #tpu.pipeline_mode<synchronous>, transform_indices = @transform_1, window_bounds = array<i64: 256, 1024>}, {pipeline_mode = #tpu.pipeline_mode<synchronous>, transform_indices = @transform_2, window_bounds = array<i64: 1, 1024>}, {pipeline_mode = #tpu.pipeline_mode<synchronous>, transform_indices = @transform_3, window_bounds = array<i64: 1024, 128>}, {pipeline_mode = #tpu.pipeline_mode<synchronous>, transform_indices = @transform_4, window_bounds = array<i64: 1, 128>}, {transform_indices = @transform_5, window_bounds = array<i64: 8, 128>}]} {
    %c0 = arith.constant 0 : index
    %c0_0 = arith.constant 0 : index
    %0 = vector.load %arg1[%c0, %c0_0] : memref<8x256xf32, #tpu.memory_space<vmem>>, vector<8x256xf32>
    %c0_1 = arith.constant 0 : index
    %c0_2 = arith.constant 0 : index
    %1 = vector.load %arg2[%c0_1, %c0_2] : memref<256x1024xf32, #tpu.memory_space<vmem>>, vector<256x1024xf32>
    %cst = arith.constant dense<0.000000e+00> : vector<8x1024xf32>
    %2 = tpu.matmul %0, %1, %cst {dimension_numbers = #tpu.dot_dimension_numbers<[1], [0], [0], [1], [0, 0, 1, 1], [], []>} : vector<8x256xf32>, vector<256x1024xf32>, vector<8x1024xf32> -> vector<8x1024xf32>
    %c0_3 = arith.constant 0 : index
    %c0_4 = arith.constant 0 : index
    %3 = vector.load %arg3[%c0_3, %c0_4] : memref<1x1024xf32, #tpu.memory_space<vmem>>, vector<1x1024xf32>
    %4 = vector.broadcast %3 : vector<1x1024xf32> to vector<8x1024xf32>
    %5 = arith.addf %2, %4 : vector<8x1024xf32>
    %cst_5 = arith.constant 0.000000e+00 : f32
    %6 = vector.broadcast %cst_5 : f32 to vector<8x1024xf32>
    %7 = arith.maximumf %5, %6 : vector<8x1024xf32>
    %c0_6 = arith.constant 0 : index
    %c0_7 = arith.constant 0 : index
    %8 = vector.load %arg4[%c0_6, %c0_7] : memref<1024x128xf32, #tpu.memory_space<vmem>>, vector<1024x128xf32>
    %cst_8 = arith.constant dense<0.000000e+00> : vector<8x128xf32>
    %9 = tpu.matmul %7, %8, %cst_8 {dimension_numbers = #tpu.dot_dimension_numbers<[1], [0], [0], [1], [0, 0, 1, 1], [], []>} : vector<8x1024xf32>, vector<1024x128xf32>, vector<8x128xf32> -> vector<8x128xf32>
    %c0_9 = arith.constant 0 : index
    %c0_10 = arith.constant 0 : index
    %10 = vector.load %arg5[%c0_9, %c0_10] : memref<1x128xf32, #tpu.memory_space<vmem>>, vector<1x128xf32>
    %11 = vector.broadcast %10 : vector<1x128xf32> to vector<8x128xf32>
    %12 = arith.addf %9, %11 : vector<8x128xf32>
    %c0_11 = arith.constant 0 : index
    %c0_12 = arith.constant 0 : index
    %13 = vector.load %arg6[%c0_11, %c0_12] : memref<8x128xf32, #tpu.memory_space<vmem>>, vector<8x128xf32>
    tpu.vector_store %arg6[%c0_11, %c0_12], %12 {strides = array<i32>} : memref<8x128xf32, #tpu.memory_space<vmem>>, vector<8x128xf32>,
    return
  }
  func.func @transform_0(%arg0: i32) -> (i32, i32) {
    %c0_i32 = arith.constant 0 : i32
    %c0_i32_0 = arith.constant 0 : i32
    return %arg0, %c0_i32 : i32, i32
  }
  func.func @transform_1(%arg0: i32) -> (i32, i32) {
    %c0_i32 = arith.constant 0 : i32
    %c0_i32_0 = arith.constant 0 : i32
    %c0_i32_1 = arith.constant 0 : i32
    return %c0_i32, %c0_i32_0 : i32, i32
  }
  func.func @transform_2(%arg0: i32) -> (i32, i32) {
    %c0_i32 = arith.constant 0 : i32
    %c0_i32_0 = arith.constant 0 : i32
    %c0_i32_1 = arith.constant 0 : i32
    return %c0_i32, %c0_i32_0 : i32, i32
  }
  func.func @transform_3(%arg0: i32) -> (i32, i32) {
    %c0_i32 = arith.constant 0 : i32
    %c0_i32_0 = arith.constant 0 : i32
    %c0_i32_1 = arith.constant 0 : i32
    return %c0_i32, %c0_i32_0 : i32, i32
  }
  func.func @transform_4(%arg0: i32) -> (i32, i32) {
    %c0_i32 = arith.constant 0 : i32
    %c0_i32_0 = arith.constant 0 : i32
    %c0_i32_1 = arith.constant 0 : i32
    return %c0_i32, %c0_i32_0 : i32, i32
  }
  func.func @transform_5(%arg0: i32) -> (i32, i32) {
    %c0_i32 = arith.constant 0 : i32
    %c0_i32_0 = arith.constant 0 : i32
    return %arg0, %c0_i32 : i32, i32
  }
}

</mosaic_0001>

<bundles_post_ra>
// kernel: tpu_custom_call.1
= control target key start
LH: loop header
LB: loop body
LE: loop exit
PB: predicated region body
PF: predicated region fallthrough
CT: control target
= control target key end

     0   :  { %10 = vsyncpa [#allocation3], 0  ;;  %s1444_s0 = inlined_call_operand.hbm [shape: f32[8,256], index: 0, kind: input, shape index: {}]   ;;  %s1445_s1 = inlined_call_operand.hbm [shape: f32[256,1024], index: 1, kind: input, shape index: {}]   ;;  %s1446_s2 = inlined_call_operand.hbm [shape: f32[1,1024], index: 2, kind: input, shape index: {}]   ;;  %s1447_s3 = inlined_call_operand.hbm [shape: f32[1024,128], index: 3, kind: input, shape index: {}]   ;;  %s1448_s4 = inlined_call_operand.vmem [shape: f32[1,128], index: 4, kind: input, shape index: {}]   ;;  %s1449_s5 = inlined_call_operand.hbm [shape: f32[8,128], index: 5, kind: output, shape index: {}]  }
   0x1   :  { %11 = vsyncpa [#allocation6], 0 }
   0x2   :  { %12 = vsyncpa [#allocation9], 0 }
   0x3   :  { %13 = vsyncpa [#allocation4], 0  ;;  %s1355_s18 = smov [#allocation5]  }
   0x4   :  { %s29_s19 = sshll.u32 %s1355_s18, 4  ;;  %s30_s19 = int_to_ptr.vmem [resolvable:$true] %s29_s19 }
   0x5   :  { %s1255_s20 = scalar_lea.vmem %s30_s19, 32768  ;;  %p1260_p1 = scmp.lt.s32.totalorder %s30_s19, %s30_s19 }
   0x6   :  { %p1256_p0 = scmp.ne.s32.totalorder %s30_s19, %s1255_s20  ;;  %p1261_p2 = scmp.lt.s32.totalorder %s1255_s20, %s1255_s20 }
   0x8   :  { %p1262_p3 = por %p1261_p2, %p1260_p1 }
   0xa   :  { %p1263_p4 = pnand %p1262_p3, %p1256_p0 }
   0xc   :  { %1266 = shalt.err (!%p1263_p4)
}
   0xd   :  { %s1356_s21 = smov 1024   ;;  %s1357_s22 = smov 64  }
   0xe   :  { %35 = dma.hbm_to_vmem [thread:$0]  %s1445_s1, 32768, %s30_s19, [#allocation6], %s1356_s21, %s1356_s21, %s1357_s22  }
   0xf   :  { %s1358_s25 = smov [#allocation2]   ;;  %s1359_s27 = smov [#allocation7]  }
  0x10   :  { %s20_s26 = sshll.u32 %s1358_s25, 4  ;;  %s42_s28 = sshll.u32 %s1359_s27, 4  ;;  %s21_s26 = int_to_ptr.vmem [resolvable:$true] %s20_s26  ;;  %s43_s28 = int_to_ptr.vmem [resolvable:$true] %s42_s28 }
  0x11   :  { %s1275_s29 = scalar_lea.vmem %s21_s26, 256  ;;  %p1280_p6 = scmp.lt.s32.totalorder %s21_s26, %s21_s26 }
  0x12   :  { %p1276_p5 = scmp.ne.s32.totalorder %s21_s26, %s1275_s29  ;;  %p1281_p7 = scmp.lt.s32.totalorder %s1275_s29, %s1275_s29 }
  0x14   :  { %p1282_p8 = por %p1281_p7, %p1280_p6 }
  0x16   :  { %p1283_p9 = pnand %p1282_p8, %p1276_p5 }
  0x18   :  { %1286 = shalt.err (!%p1283_p9)
}
  0x19   :  { %23 = dma.hbm_to_vmem [thread:$0]  %s1444_s0, 256, %s21_s26, [#allocation3]  }
  0x1a   :  { %s1295_s7 = scalar_lea.vmem %s43_s28, 128  ;;  %p1300_p11 = scmp.lt.s32.totalorder %s43_s28, %s43_s28 }
  0x1b   :  { %p1296_p10 = scmp.ne.s32.totalorder %s43_s28, %s1295_s7  ;;  %p1301_p12 = scmp.lt.s32.totalorder %s1295_s7, %s1295_s7 }
  0x1d   :  { %p1302_p13 = por %p1301_p12, %p1300_p11 }
  0x1f   :  { %p1303_p0 = pnand %p1302_p13, %p1296_p10 }
  0x21   :  { %1306 = shalt.err (!%p1303_p0)
}
  0x22   :  { %45 = dma.hbm_to_vmem [thread:$0]  %s1446_s2, 128, %s43_s28, [#allocation6]  }
  0x23   :  { %s1360_s9 = smov [#allocation8]  }
  0x24   :  { %s51_s10 = sshll.u32 %s1360_s9, 4  ;;  %s52_s10 = int_to_ptr.vmem [resolvable:$true] %s51_s10 }
  0x25   :  { %s1315_s11 = scalar_lea.vmem %s52_s10, 16384  ;;  %p1320_p2 = scmp.lt.s32.totalorder %s52_s10, %s52_s10 }
  0x26   :  { %p1316_p1 = scmp.ne.s32.totalorder %s52_s10, %s1315_s11  ;;  %p1321_p3 = scmp.lt.s32.totalorder %s1315_s11, %s1315_s11 }
  0x28   :  { %p1322_p4 = por %p1321_p3, %p1320_p2 }
  0x2a   :  { %p1323_p5 = pnand %p1322_p4, %p1316_p1 }
  0x2c   :  { %1326 = shalt.err (!%p1323_p5)
}
  0x2d   :  { %s1361_s0 = smov 128   ;;  %s1362_s12 = smov 8  }
  0x2e   :  { %57 = dma.hbm_to_vmem [thread:$0]  %s1447_s3, 16384, %s52_s10, [#allocation9], %s1361_s0, %s1361_s0, %s1362_s12  }
  0x2f   :  { %1347 = dma.done.wait [#allocation3], 256  }
  0x30   :  { %1348 = vsyncadd [#allocation3], 4294967040 }
  0x31   :  { %1349 = dma.done.wait [#allocation6], 32896  }
  0x32   :  { %1350 = vsyncadd [#allocation6], 4294934400 }
  0x33   :  { %1351 = dma.done.wait [#allocation9], 16384  }
  0x34   :  { %1352 = vsyncadd [#allocation9], 4294950912  ;;  %v195_v0 = vld [vmem:[#allocation5 + $0x3c8] sm:$0xff]  ;;  %v197_v1 = vld [vmem:[#allocation5 + $0x3d8] sm:$0xff]  ;;  %s1363_s15 = smov [#allocation10]  }
  0x35   :  { %v194_v2 = vld [vmem:[#allocation5 + $0x3c0] sm:$0xff]  ;;  %372 = vmatprep.subr.mxu0 %v195_v0  ;;  %443 = vmatprep.subr.mxu1 %v197_v1  ;;  %v196_v3 = vld [vmem:[#allocation5 + $0x3d0] sm:$0xff]  ;;  %v187_v4 = vld [vmem:[#allocation5 + $0x388] sm:$0xff]  ;;  %s1086_s16 = sshll.u32 %s1363_s15, 4  ;;  %s1087_s16 = int_to_ptr.vmem [resolvable:$true] %s1086_s16 }
  0x36   :  { %v189_v5 = vld [vmem:[#allocation5 + $0x398] sm:$0xff]  ;;  %373 = vmatpush1.msra.mxu0 %v194_v2  ;;  %444 = vmatpush1.msra.mxu1 %v196_v3  ;;  %v186_v6 = vld [vmem:[#allocation5 + $0x380] sm:$0xff]  ;;  %v188_v7 = vld [vmem:[#allocation5 + $0x390] sm:$0xff]  ;;  %s1327_s17 = scalar_lea.vmem %s1087_s16, 128  ;;  %p1332_p7 = scmp.lt.s32.totalorder %s1087_s16, %s1087_s16 }
  0x37   :  { %v179_v8 = vld [vmem:[#allocation5 + $0x348] sm:$0xff]  ;;  %374 = vmatprep.subr.mxu0 %v187_v4  ;;  %445 = vmatprep.subr.mxu1 %v189_v5  ;;  %v181_v9 = vld [vmem:[#allocation5 + $0x358] sm:$0xff]  ;;  %v178_v10 = vld [vmem:[#allocation5 + $0x340] sm:$0xff]  ;;  %p1328_p6 = scmp.ne.s32.totalorder %s1087_s16, %s1327_s17  ;;  %p1333_p8 = scmp.lt.s32.totalorder %s1327_s17, %s1327_s17 }
  0x38   :  { %v180_v11 = vld [vmem:[#allocation5 + $0x350] sm:$0xff]  ;;  %375 = vmatpush1.msra.mxu0 %v186_v6  ;;  %446 = vmatpush1.msra.mxu1 %v188_v7  ;;  %v171_v12 = vld [vmem:[#allocation5 + $0x308] sm:$0xff]  ;;  %v173_v13 = vld [vmem:[#allocation5 + $0x318] sm:$0xff] }
  0x39   :  { %376 = vmatprep.subr.mxu0 %v179_v8  ;;  %447 = vmatprep.subr.mxu1 %v181_v9  ;;  %v170_v14 = vld [vmem:[#allocation5 + $0x300] sm:$0xff]  ;;  %v172_v15 = vld [vmem:[#allocation5 + $0x310] sm:$0xff]  ;;  %v163_v16 = vld [vmem:[#allocation5 + $0x2c8] sm:$0xff]  ;;  %p1334_p9 = por %p1333_p8, %p1332_p7 }
  0x3a   :  { %377 = vmatpush1.msra.mxu0 %v178_v10  ;;  %448 = vmatpush1.msra.mxu1 %v180_v11  ;;  %v165_v17 = vld [vmem:[#allocation5 + $0x2d8] sm:$0xff]  ;;  %v162_v18 = vld [vmem:[#allocation5 + $0x2c0] sm:$0xff]  ;;  %v164_v19 = vld [vmem:[#allocation5 + $0x2d0] sm:$0xff] }
  0x3b   :  { %378 = vmatprep.subr.mxu0 %v171_v12  ;;  %449 = vmatprep.subr.mxu1 %v173_v13  ;;  %v155_v20 = vld [vmem:[#allocation5 + $0x288] sm:$0xff]  ;;  %v157_v21 = vld [vmem:[#allocation5 + $0x298] sm:$0xff]  ;;  %v154_v22 = vld [vmem:[#allocation5 + $0x280] sm:$0xff]  ;;  %p1335_p10 = pnand %p1334_p9, %p1328_p6 }
  0x3c   :  { %379 = vmatpush1.msra.mxu0 %v170_v14  ;;  %450 = vmatpush1.msra.mxu1 %v172_v15  ;;  %v156_v23 = vld [vmem:[#allocation5 + $0x290] sm:$0xff]  ;;  %v147_v24 = vld [vmem:[#allocation5 + $0x248] sm:$0xff]  ;;  %v149_v25 = vld [vmem:[#allocation5 + $0x258] sm:$0xff] }
  0x3d   :  { %380 = vmatprep.subr.mxu0 %v163_v16  ;;  %451 = vmatprep.subr.mxu1 %v165_v17  ;;  %v146_v26 = vld [vmem:[#allocation5 + $0x240] sm:$0xff]  ;;  %v148_v27 = vld [vmem:[#allocation5 + $0x250] sm:$0xff]  ;;  %v139_v28 = vld [vmem:[#allocation5 + $0x208] sm:$0xff] }
  0x3e   :  { %381 = vmatpush1.msra.mxu0 %v162_v18  ;;  %452 = vmatpush1.msra.mxu1 %v164_v19  ;;  %v141_v29 = vld [vmem:[#allocation5 + $0x218] sm:$0xff]  ;;  %v138_v30 = vld [vmem:[#allocation5 + $0x200] sm:$0xff]  ;;  %v140_v31 = vld [vmem:[#allocation5 + $0x210] sm:$0xff] }
  0x3f   :  { %382 = vmatprep.subr.mxu0 %v155_v20  ;;  %453 = vmatprep.subr.mxu1 %v157_v21  ;;  %v131_v32 = vld [vmem:[#allocation5 + $0x1c8] sm:$0xff]  ;;  %v133_v33 = vld [vmem:[#allocation5 + $0x1d8] sm:$0xff]  ;;  %v130_v34 = vld [vmem:[#allocation5 + $0x1c0] sm:$0xff] }
  0x40   :  { %383 = vmatpush1.msra.mxu0 %v154_v22  ;;  %454 = vmatpush1.msra.mxu1 %v156_v23  ;;  %v132_v35 = vld [vmem:[#allocation5 + $0x1d0] sm:$0xff]  ;;  %v123_v36 = vld [vmem:[#allocation5 + $0x188] sm:$0xff]  ;;  %v125_v37 = vld [vmem:[#allocation5 + $0x198] sm:$0xff] }
  0x41   :  { %384 = vmatprep.subr.mxu0 %v147_v24  ;;  %455 = vmatprep.subr.mxu1 %v149_v25  ;;  %v122_v38 = vld [vmem:[#allocation5 + $0x180] sm:$0xff]  ;;  %v124_v39 = vld [vmem:[#allocation5 + $0x190] sm:$0xff]  ;;  %v115_v40 = vld [vmem:[#allocation5 + $0x148] sm:$0xff] }
  0x42   :  { %385 = vmatpush1.msra.mxu0 %v146_v26  ;;  %456 = vmatpush1.msra.mxu1 %v148_v27  ;;  %v117_v41 = vld [vmem:[#allocation5 + $0x158] sm:$0xff]  ;;  %v114_v42 = vld [vmem:[#allocation5 + $0x140] sm:$0xff]  ;;  %v116_v43 = vld [vmem:[#allocation5 + $0x150] sm:$0xff] }
  0x43   :  { %386 = vmatprep.subr.mxu0 %v139_v28  ;;  %457 = vmatprep.subr.mxu1 %v141_v29  ;;  %v107_v44 = vld [vmem:[#allocation5 + $0x108] sm:$0xff]  ;;  %v109_v45 = vld [vmem:[#allocation5 + $0x118] sm:$0xff]  ;;  %v106_v46 = vld [vmem:[#allocation5 + $0x100] sm:$0xff] }
  0x44   :  { %387 = vmatpush1.msra.mxu0 %v138_v30  ;;  %458 = vmatpush1.msra.mxu1 %v140_v31  ;;  %v108_v47 = vld [vmem:[#allocation5 + $0x110] sm:$0xff]  ;;  %v99_v48 = vld [vmem:[#allocation5 + $0xc8] sm:$0xff]  ;;  %v101_v49 = vld [vmem:[#allocation5 + $0xd8] sm:$0xff] }
  0x45   :  { %388 = vmatprep.subr.mxu0 %v131_v32  ;;  %459 = vmatprep.subr.mxu1 %v133_v33  ;;  %v98_v50 = vld [vmem:[#allocation5 + $0xc0] sm:$0xff]  ;;  %v100_v51 = vld [vmem:[#allocation5 + $0xd0] sm:$0xff]  ;;  %v91_v52 = vld [vmem:[#allocation5 + $0x88] sm:$0xff] }
  0x46   :  { %389 = vmatpush1.msra.mxu0 %v130_v34  ;;  %460 = vmatpush1.msra.mxu1 %v132_v35  ;;  %v93_v53 = vld [vmem:[#allocation5 + $0x98] sm:$0xff]  ;;  %v90_v54 = vld [vmem:[#allocation5 + $0x80] sm:$0xff]  ;;  %v92_v55 = vld [vmem:[#allocation5 + $0x90] sm:$0xff] }
  0x47   :  { %390 = vmatprep.subr.mxu0 %v123_v36  ;;  %461 = vmatprep.subr.mxu1 %v125_v37  ;;  %v83_v56 = vld [vmem:[#allocation5 + $0x48] sm:$0xff]  ;;  %v85_v57 = vld [vmem:[#allocation5 + $0x58] sm:$0xff]  ;;  %v82_v58 = vld [vmem:[#allocation5 + $0x40] sm:$0xff] }
  0x48   :  { %391 = vmatpush1.msra.mxu0 %v122_v38  ;;  %462 = vmatpush1.msra.mxu1 %v124_v39  ;;  %v84_v59 = vld [vmem:[#allocation5 + $0x50] sm:$0xff]  ;;  %v75_v60 = vld [vmem:[#allocation5 + $0x8] sm:$0xff]  ;;  %v77_v61 = vld [vmem:[#allocation5 + $0x18] sm:$0xff] }
  0x49   :  { %392 = vmatprep.subr.mxu0 %v115_v40  ;;  %463 = vmatprep.subr.mxu1 %v117_v41  ;;  %v74_v62 = vld [vmem:[#allocation5] sm:$0xff]  ;;  %v76_v63 = vld [vmem:[#allocation5 + $0x10] sm:$0xff]  ;;  %v323_v0 = vld [vmem:[#allocation5 + $0x7c8] sm:$0xff] }
  0x4a   :  { %393 = vmatpush1.msra.mxu0 %v114_v42  ;;  %464 = vmatpush1.msra.mxu1 %v116_v43  ;;  %v325_v1 = vld [vmem:[#allocation5 + $0x7d8] sm:$0xff]  ;;  %v322_v2 = vld [vmem:[#allocation5 + $0x7c0] sm:$0xff]  ;;  %v324_v3 = vld [vmem:[#allocation5 + $0x7d0] sm:$0xff] }
  0x4b   :  { %394 = vmatprep.subr.mxu0 %v107_v44  ;;  %465 = vmatprep.subr.mxu1 %v109_v45  ;;  %v315_v4 = vld [vmem:[#allocation5 + $0x788] sm:$0xff]  ;;  %v317_v5 = vld [vmem:[#allocation5 + $0x798] sm:$0xff]  ;;  %v314_v6 = vld [vmem:[#allocation5 + $0x780] sm:$0xff] }
  0x4c   :  { %395 = vmatpush1.msra.mxu0 %v106_v46  ;;  %466 = vmatpush1.msra.mxu1 %v108_v47  ;;  %v316_v7 = vld [vmem:[#allocation5 + $0x790] sm:$0xff]  ;;  %v307_v8 = vld [vmem:[#allocation5 + $0x748] sm:$0xff]  ;;  %v309_v9 = vld [vmem:[#allocation5 + $0x758] sm:$0xff] }
  0x4d   :  { %396 = vmatprep.subr.mxu0 %v99_v48  ;;  %467 = vmatprep.subr.mxu1 %v101_v49  ;;  %v306_v10 = vld [vmem:[#allocation5 + $0x740] sm:$0xff]  ;;  %v308_v11 = vld [vmem:[#allocation5 + $0x750] sm:$0xff]  ;;  %v299_v12 = vld [vmem:[#allocation5 + $0x708] sm:$0xff] }
  0x4e   :  { %397 = vmatpush1.msra.mxu0 %v98_v50  ;;  %468 = vmatpush1.msra.mxu1 %v100_v51  ;;  %v301_v13 = vld [vmem:[#allocation5 + $0x718] sm:$0xff]  ;;  %v298_v14 = vld [vmem:[#allocation5 + $0x700] sm:$0xff]  ;;  %v300_v15 = vld [vmem:[#allocation5 + $0x710] sm:$0xff] }
  0x4f   :  { %398 = vmatprep.subr.mxu0 %v91_v52  ;;  %469 = vmatprep.subr.mxu1 %v93_v53  ;;  %v291_v16 = vld [vmem:[#allocation5 + $0x6c8] sm:$0xff]  ;;  %v293_v17 = vld [vmem:[#allocation5 + $0x6d8] sm:$0xff]  ;;  %v290_v18 = vld [vmem:[#allocation5 + $0x6c0] sm:$0xff] }
  0x50   :  { %399 = vmatpush1.msra.mxu0 %v90_v54  ;;  %470 = vmatpush1.msra.mxu1 %v92_v55  ;;  %v292_v19 = vld [vmem:[#allocation5 + $0x6d0] sm:$0xff]  ;;  %v283_v20 = vld [vmem:[#allocation5 + $0x688] sm:$0xff]  ;;  %v285_v21 = vld [vmem:[#allocation5 + $0x698] sm:$0xff] }
  0x51   :  { %400 = vmatprep.subr.mxu0 %v83_v56  ;;  %471 = vmatprep.subr.mxu1 %v85_v57  ;;  %v282_v22 = vld [vmem:[#allocation5 + $0x680] sm:$0xff]  ;;  %v284_v23 = vld [vmem:[#allocation5 + $0x690] sm:$0xff]  ;;  %v275_v24 = vld [vmem:[#allocation5 + $0x648] sm:$0xff] }
  0x52   :  { %401 = vmatpush1.msra.mxu0 %v82_v58  ;;  %472 = vmatpush1.msra.mxu1 %v84_v59  ;;  %v277_v25 = vld [vmem:[#allocation5 + $0x658] sm:$0xff]  ;;  %v274_v26 = vld [vmem:[#allocation5 + $0x640] sm:$0xff]  ;;  %v276_v27 = vld [vmem:[#allocation5 + $0x650] sm:$0xff] }
  0x53   :  { %402 = vmatprep.subr.mxu0 %v75_v60  ;;  %473 = vmatprep.subr.mxu1 %v77_v61  ;;  %v267_v28 = vld [vmem:[#allocation5 + $0x608] sm:$0xff]  ;;  %v269_v29 = vld [vmem:[#allocation5 + $0x618] sm:$0xff]  ;;  %v266_v30 = vld [vmem:[#allocation5 + $0x600] sm:$0xff] }
  0x54   :  { %403 = vmatpush1.msra.mxu0 %v74_v62  ;;  %474 = vmatpush1.msra.mxu1 %v76_v63  ;;  %v268_v31 = vld [vmem:[#allocation5 + $0x610] sm:$0xff]  ;;  %v259_v32 = vld [vmem:[#allocation5 + $0x5c8] sm:$0xff]  ;;  %v261_v33 = vld [vmem:[#allocation5 + $0x5d8] sm:$0xff] }
  0x55   :  { %404 = vmatprep.subr.mxu0 %v323_v0  ;;  %475 = vmatprep.subr.mxu1 %v325_v1  ;;  %v258_v34 = vld [vmem:[#allocation5 + $0x5c0] sm:$0xff]  ;;  %v260_v35 = vld [vmem:[#allocation5 + $0x5d0] sm:$0xff]  ;;  %v251_v36 = vld [vmem:[#allocation5 + $0x588] sm:$0xff] }
  0x56   :  { %405 = vmatpush2.msra.mxu0 %v322_v2  ;;  %476 = vmatpush2.msra.mxu1 %v324_v3  ;;  %v253_v37 = vld [vmem:[#allocation5 + $0x598] sm:$0xff]  ;;  %v250_v38 = vld [vmem:[#allocation5 + $0x580] sm:$0xff]  ;;  %v252_v39 = vld [vmem:[#allocation5 + $0x590] sm:$0xff] }
  0x57   :  { %406 = vmatprep.subr.mxu0 %v315_v4  ;;  %477 = vmatprep.subr.mxu1 %v317_v5  ;;  %v243_v40 = vld [vmem:[#allocation5 + $0x548] sm:$0xff]  ;;  %v245_v41 = vld [vmem:[#allocation5 + $0x558] sm:$0xff]  ;;  %v242_v42 = vld [vmem:[#allocation5 + $0x540] sm:$0xff] }
  0x58   :  { %407 = vmatpush2.msra.mxu0 %v314_v6  ;;  %478 = vmatpush2.msra.mxu1 %v316_v7  ;;  %v244_v43 = vld [vmem:[#allocation5 + $0x550] sm:$0xff]  ;;  %v235_v44 = vld [vmem:[#allocation5 + $0x508] sm:$0xff]  ;;  %v237_v45 = vld [vmem:[#allocation5 + $0x518] sm:$0xff] }
  0x59   :  { %408 = vmatprep.subr.mxu0 %v307_v8  ;;  %479 = vmatprep.subr.mxu1 %v309_v9  ;;  %v234_v46 = vld [vmem:[#allocation5 + $0x500] sm:$0xff]  ;;  %v236_v47 = vld [vmem:[#allocation5 + $0x510] sm:$0xff]  ;;  %v227_v48 = vld [vmem:[#allocation5 + $0x4c8] sm:$0xff] }
  0x5a   :  { %409 = vmatpush2.msra.mxu0 %v306_v10  ;;  %480 = vmatpush2.msra.mxu1 %v308_v11  ;;  %v229_v49 = vld [vmem:[#allocation5 + $0x4d8] sm:$0xff]  ;;  %v226_v50 = vld [vmem:[#allocation5 + $0x4c0] sm:$0xff]  ;;  %v228_v51 = vld [vmem:[#allocation5 + $0x4d0] sm:$0xff] }
  0x5b   :  { %410 = vmatprep.subr.mxu0 %v299_v12  ;;  %481 = vmatprep.subr.mxu1 %v301_v13  ;;  %v219_v52 = vld [vmem:[#allocation5 + $0x488] sm:$0xff]  ;;  %v221_v53 = vld [vmem:[#allocation5 + $0x498] sm:$0xff]  ;;  %v218_v54 = vld [vmem:[#allocation5 + $0x480] sm:$0xff] }
  0x5c   :  { %411 = vmatpush2.msra.mxu0 %v298_v14  ;;  %482 = vmatpush2.msra.mxu1 %v300_v15  ;;  %v220_v55 = vld [vmem:[#allocation5 + $0x490] sm:$0xff]  ;;  %v211_v56 = vld [vmem:[#allocation5 + $0x448] sm:$0xff]  ;;  %v213_v57 = vld [vmem:[#allocation5 + $0x458] sm:$0xff] }
  0x5d   :  { %412 = vmatprep.subr.mxu0 %v291_v16  ;;  %483 = vmatprep.subr.mxu1 %v293_v17  ;;  %v210_v58 = vld [vmem:[#allocation5 + $0x440] sm:$0xff]  ;;  %v212_v59 = vld [vmem:[#allocation5 + $0x450] sm:$0xff]  ;;  %v203_v60 = vld [vmem:[#allocation5 + $0x408] sm:$0xff] }
  0x5e   :  { %413 = vmatpush2.msra.mxu0 %v290_v18  ;;  %484 = vmatpush2.msra.mxu1 %v292_v19  ;;  %v205_v61 = vld [vmem:[#allocation5 + $0x418] sm:$0xff]  ;;  %v202_v62 = vld [vmem:[#allocation5 + $0x400] sm:$0xff]  ;;  %v204_v0 = vld [vmem:[#allocation5 + $0x410] sm:$0xff] }
  0x5f   :  { %414 = vmatprep.subr.mxu0 %v283_v20  ;;  %485 = vmatprep.subr.mxu1 %v285_v21  ;;  %v1406_v63 = vld [vmem:[#allocation2 + $0x8] sm:$0xff]  ;;  %v1408_v1 = vld [vmem:[#allocation2] sm:$0xff]  ;;  %v199_v2 = vld [vmem:[#allocation5 + $0x3e8] sm:$0xff] }
  0x60   :  { %415 = vmatpush2.msra.mxu0 %v282_v22  ;;  %486 = vmatpush2.msra.mxu1 %v284_v23  ;;  %v201_v3 = vld [vmem:[#allocation5 + $0x3f8] sm:$0xff]  ;;  %v198_v4 = vld [vmem:[#allocation5 + $0x3e0] sm:$0xff]  ;;  %v200_v5 = vld [vmem:[#allocation5 + $0x3f0] sm:$0xff] }
  0x61   :  { %416 = vmatprep.subr.mxu0 %v275_v24  ;;  %487 = vmatprep.subr.mxu1 %v277_v25  ;;  %v191_v6 = vld [vmem:[#allocation5 + $0x3a8] sm:$0xff]  ;;  %v193_v7 = vld [vmem:[#allocation5 + $0x3b8] sm:$0xff]  ;;  %v190_v8 = vld [vmem:[#allocation5 + $0x3a0] sm:$0xff] }
  0x62   :  { %417 = vmatpush2.msra.mxu0 %v274_v26  ;;  %488 = vmatpush2.msra.mxu1 %v276_v27  ;;  %v192_v9 = vld [vmem:[#allocation5 + $0x3b0] sm:$0xff]  ;;  %v183_v10 = vld [vmem:[#allocation5 + $0x368] sm:$0xff]  ;;  %v185_v11 = vld [vmem:[#allocation5 + $0x378] sm:$0xff] }
  0x63   :  { %418 = vmatprep.subr.mxu0 %v267_v28  ;;  %489 = vmatprep.subr.mxu1 %v269_v29  ;;  %v182_v12 = vld [vmem:[#allocation5 + $0x360] sm:$0xff]  ;;  %v184_v13 = vld [vmem:[#allocation5 + $0x370] sm:$0xff]  ;;  %v175_v14 = vld [vmem:[#allocation5 + $0x328] sm:$0xff] }
  0x64   :  { %419 = vmatpush2.msra.mxu0 %v266_v30  ;;  %490 = vmatpush2.msra.mxu1 %v268_v31  ;;  %v177_v15 = vld [vmem:[#allocation5 + $0x338] sm:$0xff]  ;;  %v174_v16 = vld [vmem:[#allocation5 + $0x320] sm:$0xff]  ;;  %v176_v17 = vld [vmem:[#allocation5 + $0x330] sm:$0xff] }
  0x65   :  { %420 = vmatprep.subr.mxu0 %v259_v32  ;;  %491 = vmatprep.subr.mxu1 %v261_v33  ;;  %v167_v18 = vld [vmem:[#allocation5 + $0x2e8] sm:$0xff]  ;;  %v169_v19 = vld [vmem:[#allocation5 + $0x2f8] sm:$0xff]  ;;  %v166_v20 = vld [vmem:[#allocation5 + $0x2e0] sm:$0xff] }
  0x66   :  { %421 = vmatpush2.msra.mxu0 %v258_v34  ;;  %492 = vmatpush2.msra.mxu1 %v260_v35  ;;  %v168_v21 = vld [vmem:[#allocation5 + $0x2f0] sm:$0xff]  ;;  %v159_v22 = vld [vmem:[#allocation5 + $0x2a8] sm:$0xff]  ;;  %v161_v23 = vld [vmem:[#allocation5 + $0x2b8] sm:$0xff] }
  0x67   :  { %422 = vmatprep.subr.mxu0 %v251_v36  ;;  %493 = vmatprep.subr.mxu1 %v253_v37  ;;  %v158_v24 = vld [vmem:[#allocation5 + $0x2a0] sm:$0xff]  ;;  %v160_v25 = vld [vmem:[#allocation5 + $0x2b0] sm:$0xff]  ;;  %v151_v26 = vld [vmem:[#allocation5 + $0x268] sm:$0xff] }
  0x68   :  { %423 = vmatpush2.msra.mxu0 %v250_v38  ;;  %494 = vmatpush2.msra.mxu1 %v252_v39  ;;  %v153_v27 = vld [vmem:[#allocation5 + $0x278] sm:$0xff]  ;;  %v150_v28 = vld [vmem:[#allocation5 + $0x260] sm:$0xff]  ;;  %v152_v29 = vld [vmem:[#allocation5 + $0x270] sm:$0xff] }
  0x69   :  { %424 = vmatprep.subr.mxu0 %v243_v40  ;;  %495 = vmatprep.subr.mxu1 %v245_v41  ;;  %v143_v30 = vld [vmem:[#allocation5 + $0x228] sm:$0xff]  ;;  %v145_v31 = vld [vmem:[#allocation5 + $0x238] sm:$0xff]  ;;  %v142_v32 = vld [vmem:[#allocation5 + $0x220] sm:$0xff] }
  0x6a   :  { %425 = vmatpush2.msra.mxu0 %v242_v42  ;;  %496 = vmatpush2.msra.mxu1 %v244_v43  ;;  %v144_v33 = vld [vmem:[#allocation5 + $0x230] sm:$0xff]  ;;  %v135_v34 = vld [vmem:[#allocation5 + $0x1e8] sm:$0xff]  ;;  %v137_v35 = vld [vmem:[#allocation5 + $0x1f8] sm:$0xff] }
  0x6b   :  { %426 = vmatprep.subr.mxu0 %v235_v44  ;;  %497 = vmatprep.subr.mxu1 %v237_v45  ;;  %v134_v36 = vld [vmem:[#allocation5 + $0x1e0] sm:$0xff]  ;;  %v136_v37 = vld [vmem:[#allocation5 + $0x1f0] sm:$0xff]  ;;  %v127_v38 = vld [vmem:[#allocation5 + $0x1a8] sm:$0xff] }
  0x6c   :  { %427 = vmatpush2.msra.mxu0 %v234_v46  ;;  %498 = vmatpush2.msra.mxu1 %v236_v47  ;;  %v129_v39 = vld [vmem:[#allocation5 + $0x1b8] sm:$0xff]  ;;  %v126_v40 = vld [vmem:[#allocation5 + $0x1a0] sm:$0xff]  ;;  %v128_v41 = vld [vmem:[#allocation5 + $0x1b0] sm:$0xff] }
  0x6d   :  { %428 = vmatprep.subr.mxu0 %v227_v48  ;;  %499 = vmatprep.subr.mxu1 %v229_v49  ;;  %v119_v42 = vld [vmem:[#allocation5 + $0x168] sm:$0xff]  ;;  %v121_v43 = vld [vmem:[#allocation5 + $0x178] sm:$0xff]  ;;  %v118_v44 = vld [vmem:[#allocation5 + $0x160] sm:$0xff] }
  0x6e   :  { %429 = vmatpush2.msra.mxu0 %v226_v50  ;;  %500 = vmatpush2.msra.mxu1 %v228_v51  ;;  %v120_v45 = vld [vmem:[#allocation5 + $0x170] sm:$0xff]  ;;  %v111_v46 = vld [vmem:[#allocation5 + $0x128] sm:$0xff]  ;;  %v113_v47 = vld [vmem:[#allocation5 + $0x138] sm:$0xff] }
  0x6f   :  { %430 = vmatprep.subr.mxu0 %v219_v52  ;;  %501 = vmatprep.subr.mxu1 %v221_v53  ;;  %v110_v48 = vld [vmem:[#allocation5 + $0x120] sm:$0xff]  ;;  %v112_v49 = vld [vmem:[#allocation5 + $0x130] sm:$0xff]  ;;  %v103_v50 = vld [vmem:[#allocation5 + $0xe8] sm:$0xff] }
  0x70   :  { %431 = vmatpush2.msra.mxu0 %v218_v54  ;;  %502 = vmatpush2.msra.mxu1 %v220_v55  ;;  %v105_v51 = vld [vmem:[#allocation5 + $0xf8] sm:$0xff]  ;;  %v102_v52 = vld [vmem:[#allocation5 + $0xe0] sm:$0xff]  ;;  %v104_v53 = vld [vmem:[#allocation5 + $0xf0] sm:$0xff] }
  0x71   :  { %432 = vmatprep.subr.mxu0 %v211_v56  ;;  %503 = vmatprep.subr.mxu1 %v213_v57  ;;  %v95_v54 = vld [vmem:[#allocation5 + $0xa8] sm:$0xff]  ;;  %v97_v55 = vld [vmem:[#allocation5 + $0xb8] sm:$0xff]  ;;  %v94_v56 = vld [vmem:[#allocation5 + $0xa0] sm:$0xff] }
  0x72   :  { %433 = vmatpush2.msra.mxu0 %v210_v58  ;;  %504 = vmatpush2.msra.mxu1 %v212_v59  ;;  %v96_v57 = vld [vmem:[#allocation5 + $0xb0] sm:$0xff]  ;;  %v87_v58 = vld [vmem:[#allocation5 + $0x68] sm:$0xff]  ;;  %v89_v59 = vld [vmem:[#allocation5 + $0x78] sm:$0xff] }
  0x73   :  { %434 = vmatprep.subr.mxu0 %v203_v60  ;;  %505 = vmatprep.subr.mxu1 %v205_v61  ;;  %v86_v60 = vld [vmem:[#allocation5 + $0x60] sm:$0xff]  ;;  %v88_v61 = vld [vmem:[#allocation5 + $0x70] sm:$0xff] }
  0x74   :  { %435 = vmatpush2.msra.mxu0 %v202_v62  ;;  %436 = vmatprep.mubr.f32.mxu0 %v1406_v63  ;;  %v79_v62 = vld [vmem:[#allocation5 + $0x28] sm:$0xff] }
  0x75   :  { %506 = vmatpush2.msra.mxu1 %v204_v0  ;;  %507 = vmatprep.mubr.f32.mxu1 %v1406_v63  ;;  %v81_v0 = vld [vmem:[#allocation5 + $0x38] sm:$0xff] }
  0x76   :  { %437 = vmatmul.mubr.f32.vlgmr.msra.gmra.mxu0 %v1408_v1  ;;  %508 = vmatmul.mubr.f32.vlgmr.msra.gmra.mxu1 %v1408_v1 }
  0x77   :  { %514 = vmatprep.subr.mxu0 %v199_v2  ;;  %585 = vmatprep.subr.mxu1 %v201_v3  ;;  %v78_v2 = vld [vmem:[#allocation5 + $0x20] sm:$0xff]  ;;  %v80_v3 = vld [vmem:[#allocation5 + $0x30] sm:$0xff] }
  0x78   :  { %515 = vmatpush1.msra.mxu0 %v198_v4  ;;  %586 = vmatpush1.msra.mxu1 %v200_v5  ;;  %v327_v4 = vld [vmem:[#allocation5 + $0x7e8] sm:$0xff]  ;;  %v329_v5 = vld [vmem:[#allocation5 + $0x7f8] sm:$0xff] }
  0x79   :  { %516 = vmatprep.subr.mxu0 %v191_v6  ;;  %587 = vmatprep.subr.mxu1 %v193_v7  ;;  %v326_v6 = vld [vmem:[#allocation5 + $0x7e0] sm:$0xff]  ;;  %v328_v7 = vld [vmem:[#allocation5 + $0x7f0] sm:$0xff] }
  0x7a   :  { %517 = vmatpush1.msra.mxu0 %v190_v8  ;;  %588 = vmatpush1.msra.mxu1 %v192_v9  ;;  %v319_v8 = vld [vmem:[#allocation5 + $0x7a8] sm:$0xff]  ;;  %v321_v9 = vld [vmem:[#allocation5 + $0x7b8] sm:$0xff] }
  0x7b   :  { %518 = vmatprep.subr.mxu0 %v183_v10  ;;  %589 = vmatprep.subr.mxu1 %v185_v11  ;;  %v318_v10 = vld [vmem:[#allocation5 + $0x7a0] sm:$0xff]  ;;  %v320_v11 = vld [vmem:[#allocation5 + $0x7b0] sm:$0xff] }
  0x7c   :  { %519 = vmatpush1.msra.mxu0 %v182_v12  ;;  %590 = vmatpush1.msra.mxu1 %v184_v13  ;;  %v311_v12 = vld [vmem:[#allocation5 + $0x768] sm:$0xff]  ;;  %v313_v13 = vld [vmem:[#allocation5 + $0x778] sm:$0xff] }
  0x7d   :  { %520 = vmatprep.subr.mxu0 %v175_v14  ;;  %591 = vmatprep.subr.mxu1 %v177_v15  ;;  %v310_v14 = vld [vmem:[#allocation5 + $0x760] sm:$0xff]  ;;  %v312_v15 = vld [vmem:[#allocation5 + $0x770] sm:$0xff] }
  0x7e   :  { %521 = vmatpush1.msra.mxu0 %v174_v16  ;;  %592 = vmatpush1.msra.mxu1 %v176_v17  ;;  %v303_v16 = vld [vmem:[#allocation5 + $0x728] sm:$0xff]  ;;  %v305_v17 = vld [vmem:[#allocation5 + $0x738] sm:$0xff] }
  0x7f   :  { %522 = vmatprep.subr.mxu0 %v167_v18  ;;  %593 = vmatprep.subr.mxu1 %v169_v19  ;;  %v302_v18 = vld [vmem:[#allocation5 + $0x720] sm:$0xff]  ;;  %v304_v19 = vld [vmem:[#allocation5 + $0x730] sm:$0xff] }
  0x80   :  { %523 = vmatpush1.msra.mxu0 %v166_v20  ;;  %594 = vmatpush1.msra.mxu1 %v168_v21  ;;  %v295_v20 = vld [vmem:[#allocation5 + $0x6e8] sm:$0xff]  ;;  %v297_v21 = vld [vmem:[#allocation5 + $0x6f8] sm:$0xff] }
  0x81   :  { %524 = vmatprep.subr.mxu0 %v159_v22  ;;  %595 = vmatprep.subr.mxu1 %v161_v23  ;;  %v294_v22 = vld [vmem:[#allocation5 + $0x6e0] sm:$0xff]  ;;  %v296_v23 = vld [vmem:[#allocation5 + $0x6f0] sm:$0xff] }
  0x82   :  { %525 = vmatpush1.msra.mxu0 %v158_v24  ;;  %596 = vmatpush1.msra.mxu1 %v160_v25  ;;  %v287_v24 = vld [vmem:[#allocation5 + $0x6a8] sm:$0xff]  ;;  %v289_v25 = vld [vmem:[#allocation5 + $0x6b8] sm:$0xff] }
  0x83   :  { %526 = vmatprep.subr.mxu0 %v151_v26  ;;  %597 = vmatprep.subr.mxu1 %v153_v27  ;;  %v286_v26 = vld [vmem:[#allocation5 + $0x6a0] sm:$0xff]  ;;  %v288_v27 = vld [vmem:[#allocation5 + $0x6b0] sm:$0xff] }
  0x84   :  { %527 = vmatpush1.msra.mxu0 %v150_v28  ;;  %598 = vmatpush1.msra.mxu1 %v152_v29  ;;  %v279_v28 = vld [vmem:[#allocation5 + $0x668] sm:$0xff]  ;;  %v281_v29 = vld [vmem:[#allocation5 + $0x678] sm:$0xff] }
  0x85   :  { %528 = vmatprep.subr.mxu0 %v143_v30  ;;  %599 = vmatprep.subr.mxu1 %v145_v31  ;;  %v278_v30 = vld [vmem:[#allocation5 + $0x660] sm:$0xff]  ;;  %v280_v31 = vld [vmem:[#allocation5 + $0x670] sm:$0xff] }
  0x86   :  { %529 = vmatpush1.msra.mxu0 %v142_v32  ;;  %600 = vmatpush1.msra.mxu1 %v144_v33  ;;  %v271_v32 = vld [vmem:[#allocation5 + $0x628] sm:$0xff]  ;;  %v273_v33 = vld [vmem:[#allocation5 + $0x638] sm:$0xff] }
  0x87   :  { %530 = vmatprep.subr.mxu0 %v135_v34  ;;  %601 = vmatprep.subr.mxu1 %v137_v35  ;;  %v270_v34 = vld [vmem:[#allocation5 + $0x620] sm:$0xff]  ;;  %v272_v35 = vld [vmem:[#allocation5 + $0x630] sm:$0xff] }
  0x88   :  { %531 = vmatpush1.msra.mxu0 %v134_v36  ;;  %602 = vmatpush1.msra.mxu1 %v136_v37  ;;  %v263_v36 = vld [vmem:[#allocation5 + $0x5e8] sm:$0xff]  ;;  %v265_v37 = vld [vmem:[#allocation5 + $0x5f8] sm:$0xff] }
  0x89   :  { %532 = vmatprep.subr.mxu0 %v127_v38  ;;  %603 = vmatprep.subr.mxu1 %v129_v39  ;;  %v262_v38 = vld [vmem:[#allocation5 + $0x5e0] sm:$0xff]  ;;  %v264_v39 = vld [vmem:[#allocation5 + $0x5f0] sm:$0xff] }
  0x8a   :  { %533 = vmatpush1.msra.mxu0 %v126_v40  ;;  %604 = vmatpush1.msra.mxu1 %v128_v41  ;;  %v255_v40 = vld [vmem:[#allocation5 + $0x5a8] sm:$0xff]  ;;  %v257_v41 = vld [vmem:[#allocation5 + $0x5b8] sm:$0xff] }
  0x8b   :  { %534 = vmatprep.subr.mxu0 %v119_v42  ;;  %605 = vmatprep.subr.mxu1 %v121_v43  ;;  %v254_v42 = vld [vmem:[#allocation5 + $0x5a0] sm:$0xff]  ;;  %v256_v43 = vld [vmem:[#allocation5 + $0x5b0] sm:$0xff] }
  0x8c   :  { %535 = vmatpush1.msra.mxu0 %v118_v44  ;;  %606 = vmatpush1.msra.mxu1 %v120_v45  ;;  %v247_v44 = vld [vmem:[#allocation5 + $0x568] sm:$0xff]  ;;  %v249_v45 = vld [vmem:[#allocation5 + $0x578] sm:$0xff] }
  0x8d   :  { %536 = vmatprep.subr.mxu0 %v111_v46  ;;  %607 = vmatprep.subr.mxu1 %v113_v47  ;;  %v246_v46 = vld [vmem:[#allocation5 + $0x560] sm:$0xff]  ;;  %v248_v47 = vld [vmem:[#allocation5 + $0x570] sm:$0xff] }
  0x8e   :  { %537 = vmatpush1.msra.mxu0 %v110_v48  ;;  %608 = vmatpush1.msra.mxu1 %v112_v49  ;;  %v239_v48 = vld [vmem:[#allocation5 + $0x528] sm:$0xff]  ;;  %v241_v49 = vld [vmem:[#allocation5 + $0x538] sm:$0xff] }
  0x8f   :  { %538 = vmatprep.subr.mxu0 %v103_v50  ;;  %609 = vmatprep.subr.mxu1 %v105_v51  ;;  %v238_v50 = vld [vmem:[#allocation5 + $0x520] sm:$0xff]  ;;  %v240_v51 = vld [vmem:[#allocation5 + $0x530] sm:$0xff] }
  0x90   :  { %539 = vmatpush1.msra.mxu0 %v102_v52  ;;  %610 = vmatpush1.msra.mxu1 %v104_v53  ;;  %v231_v52 = vld [vmem:[#allocation5 + $0x4e8] sm:$0xff]  ;;  %v233_v53 = vld [vmem:[#allocation5 + $0x4f8] sm:$0xff] }
  0x91   :  { %540 = vmatprep.subr.mxu0 %v95_v54  ;;  %611 = vmatprep.subr.mxu1 %v97_v55  ;;  %v230_v54 = vld [vmem:[#allocation5 + $0x4e0] sm:$0xff]  ;;  %v232_v55 = vld [vmem:[#allocation5 + $0x4f0] sm:$0xff] }
  0x92   :  { %541 = vmatpush1.msra.mxu0 %v94_v56  ;;  %612 = vmatpush1.msra.mxu1 %v96_v57  ;;  %v223_v56 = vld [vmem:[#allocation5 + $0x4a8] sm:$0xff]  ;;  %v225_v57 = vld [vmem:[#allocation5 + $0x4b8] sm:$0xff] }
  0x93   :  { %542 = vmatprep.subr.mxu0 %v87_v58  ;;  %613 = vmatprep.subr.mxu1 %v89_v59  ;;  %v222_v58 = vld [vmem:[#allocation5 + $0x4a0] sm:$0xff]  ;;  %v224_v59 = vld [vmem:[#allocation5 + $0x4b0] sm:$0xff] }
  0x94   :  { %543 = vmatpush1.msra.mxu0 %v86_v60  ;;  %614 = vmatpush1.msra.mxu1 %v88_v61  ;;  %v215_v60 = vld [vmem:[#allocation5 + $0x468] sm:$0xff]  ;;  %v217_v61 = vld [vmem:[#allocation5 + $0x478] sm:$0xff] }
  0x95   :  { %544 = vmatprep.subr.mxu0 %v79_v62  ;;  %615 = vmatprep.subr.mxu1 %v81_v0  ;;  %v214_v62 = vld [vmem:[#allocation5 + $0x460] sm:$0xff]  ;;  %v216_v0 = vld [vmem:[#allocation5 + $0x470] sm:$0xff] }
  0x96   :  { %545 = vmatpush1.msra.mxu0 %v78_v2  ;;  %616 = vmatpush1.msra.mxu1 %v80_v3  ;;  %v207_v2 = vld [vmem:[#allocation5 + $0x428] sm:$0xff]  ;;  %v209_v3 = vld [vmem:[#allocation5 + $0x438] sm:$0xff] }
  0x97   :  { %546 = vmatprep.subr.mxu0 %v327_v4  ;;  %617 = vmatprep.subr.mxu1 %v329_v5  ;;  %v206_v4 = vld [vmem:[#allocation5 + $0x420] sm:$0xff]  ;;  %v208_v5 = vld [vmem:[#allocation5 + $0x430] sm:$0xff] }
  0x98   :  { %547 = vmatpush2.msra.mxu0 %v326_v6  ;;  %618 = vmatpush2.msra.mxu1 %v328_v7  ;;  %v695_v6 = vld [vmem:[#allocation8 + $0xf8] sm:$0xff] }
  0x99   :  { %548 = vmatprep.subr.mxu0 %v319_v8  ;;  %619 = vmatprep.subr.mxu1 %v321_v9  ;;  %v727_v7 = vld [vmem:[#allocation8 + $0x1f8] sm:$0xff] }
  0x9a   :  { %549 = vmatpush2.msra.mxu0 %v318_v10  ;;  %620 = vmatpush2.msra.mxu1 %v320_v11  ;;  %v679_v8 = vld [vmem:[#allocation8 + $0x78] sm:$0xff]  ;;  %v694_v10 = vld [vmem:[#allocation8 + $0xf0] sm:$0xff] }
  0x9b   :  { %550 = vmatprep.subr.mxu0 %v311_v12  ;;  %621 = vmatprep.subr.mxu1 %v313_v13  ;;  %v711_v9 = vld [vmem:[#allocation8 + $0x178] sm:$0xff]  ;;  %v726_v11 = vld [vmem:[#allocation8 + $0x1f0] sm:$0xff] }
  0x9c   :  { %551 = vmatpush2.msra.mxu0 %v310_v14  ;;  %622 = vmatpush2.msra.mxu1 %v312_v15  ;;  %v678_v12 = vld [vmem:[#allocation8 + $0x70] sm:$0xff]  ;;  %v693_v14 = vld [vmem:[#allocation8 + $0xe8] sm:$0xff] }
  0x9d   :  { %552 = vmatprep.subr.mxu0 %v303_v16  ;;  %623 = vmatprep.subr.mxu1 %v305_v17  ;;  %v710_v13 = vld [vmem:[#allocation8 + $0x170] sm:$0xff]  ;;  %v725_v15 = vld [vmem:[#allocation8 + $0x1e8] sm:$0xff]  ;;  %v692_v17 = vld [vmem:[#allocation8 + $0xe0] sm:$0xff] }
  0x9e   :  { %553 = vmatpush2.msra.mxu0 %v302_v18  ;;  %624 = vmatpush2.msra.mxu1 %v304_v19  ;;  %v677_v16 = vld [vmem:[#allocation8 + $0x68] sm:$0xff]  ;;  %v724_v18 = vld [vmem:[#allocation8 + $0x1e0] sm:$0xff] }
  0x9f   :  { %554 = vmatprep.subr.mxu0 %v295_v20  ;;  %625 = vmatprep.subr.mxu1 %v297_v21  ;;  %v708_v19 = vld [vmem:[#allocation8 + $0x160] sm:$0xff]  ;;  %v691_v20 = vld [vmem:[#allocation8 + $0xd8] sm:$0xff] }
  0xa0   :  { %555 = vmatpush2.msra.mxu0 %v294_v22  ;;  %626 = vmatpush2.msra.mxu1 %v296_v23  ;;  %v723_v21 = vld [vmem:[#allocation8 + $0x1d8] sm:$0xff] }
  0xa1   :  { %556 = vmatprep.subr.mxu0 %v287_v24  ;;  %627 = vmatprep.subr.mxu1 %v289_v25  ;;  %v675_v22 = vld [vmem:[#allocation8 + $0x58] sm:$0xff]  ;;  %v690_v24 = vld [vmem:[#allocation8 + $0xd0] sm:$0xff] }
  0xa2   :  { %557 = vmatpush2.msra.mxu0 %v286_v26  ;;  %628 = vmatpush2.msra.mxu1 %v288_v27  ;;  %v707_v23 = vld [vmem:[#allocation8 + $0x158] sm:$0xff]  ;;  %v722_v25 = vld [vmem:[#allocation8 + $0x1d0] sm:$0xff] }
  0xa3   :  { %558 = vmatprep.subr.mxu0 %v279_v28  ;;  %629 = vmatprep.subr.mxu1 %v281_v29  ;;  %v674_v26 = vld [vmem:[#allocation8 + $0x50] sm:$0xff]  ;;  %v689_v28 = vld [vmem:[#allocation8 + $0xc8] sm:$0xff] }
  0xa4   :  { %559 = vmatpush2.msra.mxu0 %v278_v30  ;;  %630 = vmatpush2.msra.mxu1 %v280_v31  ;;  %v706_v27 = vld [vmem:[#allocation8 + $0x150] sm:$0xff]  ;;  %v721_v29 = vld [vmem:[#allocation8 + $0x1c8] sm:$0xff] }
  0xa5   :  { %560 = vmatprep.subr.mxu0 %v271_v32  ;;  %631 = vmatprep.subr.mxu1 %v273_v33  ;;  %v673_v30 = vld [vmem:[#allocation8 + $0x48] sm:$0xff]  ;;  %v688_v32 = vld [vmem:[#allocation8 + $0xc0] sm:$0xff] }
  0xa6   :  { %561 = vmatpush2.msra.mxu0 %v270_v34  ;;  %632 = vmatpush2.msra.mxu1 %v272_v35  ;;  %v705_v31 = vld [vmem:[#allocation8 + $0x148] sm:$0xff]  ;;  %v720_v33 = vld [vmem:[#allocation8 + $0x1c0] sm:$0xff] }
  0xa7   :  { %562 = vmatprep.subr.mxu0 %v263_v36  ;;  %633 = vmatprep.subr.mxu1 %v265_v37  ;;  %v672_v34 = vld [vmem:[#allocation8 + $0x40] sm:$0xff]  ;;  %v687_v36 = vld [vmem:[#allocation8 + $0xb8] sm:$0xff] }
  0xa8   :  { %563 = vmatpush2.msra.mxu0 %v262_v38  ;;  %634 = vmatpush2.msra.mxu1 %v264_v39  ;;  %v704_v35 = vld [vmem:[#allocation8 + $0x140] sm:$0xff]  ;;  %v719_v37 = vld [vmem:[#allocation8 + $0x1b8] sm:$0xff] }
  0xa9   :  { %564 = vmatprep.subr.mxu0 %v255_v40  ;;  %635 = vmatprep.subr.mxu1 %v257_v41  ;;  %v671_v38 = vld [vmem:[#allocation8 + $0x38] sm:$0xff]  ;;  %v686_v40 = vld [vmem:[#allocation8 + $0xb0] sm:$0xff] }
  0xaa   :  { %565 = vmatpush2.msra.mxu0 %v254_v42  ;;  %636 = vmatpush2.msra.mxu1 %v256_v43  ;;  %v703_v39 = vld [vmem:[#allocation8 + $0x138] sm:$0xff]  ;;  %v718_v41 = vld [vmem:[#allocation8 + $0x1b0] sm:$0xff] }
  0xab   :  { %566 = vmatprep.subr.mxu0 %v247_v44  ;;  %637 = vmatprep.subr.mxu1 %v249_v45  ;;  %v670_v42 = vld [vmem:[#allocation8 + $0x30] sm:$0xff]  ;;  %v685_v44 = vld [vmem:[#allocation8 + $0xa8] sm:$0xff] }
  0xac   :  { %567 = vmatpush2.msra.mxu0 %v246_v46  ;;  %638 = vmatpush2.msra.mxu1 %v248_v47  ;;  %v702_v43 = vld [vmem:[#allocation8 + $0x130] sm:$0xff]  ;;  %v717_v45 = vld [vmem:[#allocation8 + $0x1a8] sm:$0xff] }
  0xad   :  { %568 = vmatprep.subr.mxu0 %v239_v48  ;;  %639 = vmatprep.subr.mxu1 %v241_v49  ;;  %v669_v46 = vld [vmem:[#allocation8 + $0x28] sm:$0xff]  ;;  %v684_v48 = vld [vmem:[#allocation8 + $0xa0] sm:$0xff] }
  0xae   :  { %569 = vmatpush2.msra.mxu0 %v238_v50  ;;  %640 = vmatpush2.msra.mxu1 %v240_v51  ;;  %v701_v47 = vld [vmem:[#allocation8 + $0x128] sm:$0xff]  ;;  %v716_v49 = vld [vmem:[#allocation8 + $0x1a0] sm:$0xff] }
  0xaf   :  { %570 = vmatprep.subr.mxu0 %v231_v52  ;;  %641 = vmatprep.subr.mxu1 %v233_v53  ;;  %v668_v50 = vld [vmem:[#allocation8 + $0x20] sm:$0xff]  ;;  %v683_v52 = vld [vmem:[#allocation8 + $0x98] sm:$0xff] }
  0xb0   :  { %571 = vmatpush2.msra.mxu0 %v230_v54  ;;  %642 = vmatpush2.msra.mxu1 %v232_v55  ;;  %v700_v51 = vld [vmem:[#allocation8 + $0x120] sm:$0xff]  ;;  %v715_v53 = vld [vmem:[#allocation8 + $0x198] sm:$0xff] }
  0xb1   :  { %572 = vmatprep.subr.mxu0 %v223_v56  ;;  %643 = vmatprep.subr.mxu1 %v225_v57  ;;  %v667_v54 = vld [vmem:[#allocation8 + $0x18] sm:$0xff]  ;;  %v682_v56 = vld [vmem:[#allocation8 + $0x90] sm:$0xff] }
  0xb2   :  { %573 = vmatpush2.msra.mxu0 %v222_v58  ;;  %644 = vmatpush2.msra.mxu1 %v224_v59  ;;  %v699_v55 = vld [vmem:[#allocation8 + $0x118] sm:$0xff]  ;;  %v714_v57 = vld [vmem:[#allocation8 + $0x190] sm:$0xff] }
  0xb3   :  { %574 = vmatprep.subr.mxu0 %v215_v60  ;;  %645 = vmatprep.subr.mxu1 %v217_v61  ;;  %v666_v58 = vld [vmem:[#allocation8 + $0x10] sm:$0xff]  ;;  %v681_v60 = vld [vmem:[#allocation8 + $0x88] sm:$0xff] }
  0xb4   :  { %575 = vmatpush2.msra.mxu0 %v214_v62  ;;  %646 = vmatpush2.msra.mxu1 %v216_v0  ;;  %v698_v59 = vld [vmem:[#allocation8 + $0x110] sm:$0xff]  ;;  %v713_v61 = vld [vmem:[#allocation8 + $0x188] sm:$0xff] }
  0xb5   :  { %576 = vmatprep.subr.mxu0 %v207_v2  ;;  %647 = vmatprep.subr.mxu1 %v209_v3  ;;  %v665_v62 = vld [vmem:[#allocation8 + $0x8] sm:$0xff]  ;;  %v680_v2 = vld [vmem:[#allocation8 + $0x80] sm:$0xff] }
  0xb6   :  { %577 = vmatpush2.msra.mxu0 %v206_v4  ;;  %578 = vmatprep.mubr.f32.mxu0 %v1406_v63  ;;  %v697_v0 = vld [vmem:[#allocation8 + $0x108] sm:$0xff]  ;;  %v712_v3 = vld [vmem:[#allocation8 + $0x180] sm:$0xff] }
  0xb7   :  { %648 = vmatpush2.msra.mxu1 %v208_v5  ;;  %649 = vmatprep.mubr.f32.mxu1 %v1406_v63  ;;  %v709_v63 = vld [vmem:[#allocation8 + $0x168] sm:$0xff]  ;;  %v664_v4 = vld [vmem:[#allocation8] sm:$0xff] }
  0xb8   :  { %579 = vmatmul.mubr.f32.vlgmr.msra.gmra.mxu0 %v1408_v1  ;;  %650 = vmatmul.mubr.f32.vlgmr.msra.gmra.mxu1 %v1408_v1  ;;  %v676_v1 = vld [vmem:[#allocation8 + $0x60] sm:$0xff] }
  0xb9   :  { %1098 = vmatprep.subr.mxu0 %v695_v6  ;;  %1133 = vmatprep.subr.mxu1 %v727_v7  ;;  %v696_v5 = vld [vmem:[#allocation8 + $0x100] sm:$0xff]  ;;  %v759_v6 = vld [vmem:[#allocation8 + $0x2f8] sm:$0xff] }
  0xba   :  { %1099 = vmatpush3.msra.mxu0 %v679_v8  ;;  %1134 = vmatpush3.msra.mxu1 %v711_v9  ;;  %v791_v7 = vld [vmem:[#allocation8 + $0x3f8] sm:$0xff]  ;;  %v332_v8 = vlaneseq }
  0xbb   :  { %1100 = vmatprep.subr.mxu0 %v694_v10  ;;  %1135 = vmatprep.subr.mxu1 %v726_v11 }
  0xbc   :  { %1101 = vmatpush3.msra.mxu0 %v678_v12  ;;  %1136 = vmatpush3.msra.mxu1 %v710_v13  ;;  %v1418_v9 = vshrl.u32 %v332_v8, 7  ;;  %v1422_v12 = vld [vmem:[#allocation7] sm:$0xff]  ;;  %v765_v8 = vld [vmem:[#allocation8 + $0x328] sm:$0xff] }
  0xbd   :  { %1102 = vmatprep.subr.mxu0 %v693_v14  ;;  %1137 = vmatprep.subr.mxu1 %v725_v15 }
  0xbe   :  { %1103 = vmatpush3.msra.mxu0 %v677_v16  ;;  %1138 = vmatpush3.msra.mxu1 %v709_v63  ;;  %v342_v10 = vsub.s32 2, %v1418_v9  ;;  %v334_v11 = vsub.s32 0, %v1418_v9  ;;  %v338_v13 = vsub.s32 1, %v1418_v9  ;;  %v346_v14 = vsub.s32 3, %v1418_v9 }
  0xbf   :  { %1104 = vmatprep.subr.mxu0 %v692_v17  ;;  %1139 = vmatprep.subr.mxu1 %v724_v18 }
  0xc0   :  { %1105 = vmatpush3.msra.mxu0 %v676_v1  ;;  %1140 = vmatpush3.msra.mxu1 %v708_v19  ;;  %v343_v15 = vrot.slane %v1422_v12, %v342_v10  ;;  %v335_v16 = vrot.slane %v1422_v12, %v334_v11  ;;  %v339_v63 = vrot.slane %v1422_v12, %v338_v13  ;;  %v748_v10 = vld [vmem:[#allocation8 + $0x2a0] sm:$0xff] }
  0xc1   :  { %1106 = vmatprep.subr.mxu0 %v691_v20  ;;  %1141 = vmatprep.subr.mxu1 %v723_v21  ;;  %v347_v17 = vrot.slane %v1422_v12, %v346_v14  ;;  %v780_v11 = vld [vmem:[#allocation8 + $0x3a0] sm:$0xff] }
  0xc2   :  { %1107 = vmatpush3.msra.mxu0 %v675_v22  ;;  %1142 = vmatpush3.msra.mxu1 %v707_v23  ;;  %v732_v13 = vld [vmem:[#allocation8 + $0x220] sm:$0xff] }
  0xc3   :  { %1108 = vmatprep.subr.mxu0 %v690_v24  ;;  %1143 = vmatprep.subr.mxu1 %v722_v25  ;;  %v764_v14 = vld [vmem:[#allocation8 + $0x320] sm:$0xff] }
  0xc4   :  { %1109 = vmatpush3.msra.mxu0 %v674_v26  ;;  %1144 = vmatpush3.msra.mxu1 %v706_v27 }
  0xc5   :  { %1110 = vmatprep.subr.mxu0 %v689_v28  ;;  %1145 = vmatprep.subr.mxu1 %v721_v29  ;;  %v743_v29 = vld [vmem:[#allocation8 + $0x278] sm:$0xff] }
  0xc6   :  { %1111 = vmatpush3.msra.mxu0 %v673_v30  ;;  %1146 = vmatpush3.msra.mxu1 %v705_v31  ;;  %v775_v30 = vld [vmem:[#allocation8 + $0x378] sm:$0xff]  ;;  %v758_v31 = vld [vmem:[#allocation8 + $0x2f0] sm:$0xff] }
  0xc7   :  { %1112 = vmatprep.subr.mxu0 %v688_v32  ;;  %1147 = vmatprep.subr.mxu1 %v720_v33  ;;  %v790_v32 = vld [vmem:[#allocation8 + $0x3f0] sm:$0xff] }
  0xc8   :  { %1113 = vmatpush3.msra.mxu0 %v672_v34  ;;  %1148 = vmatpush3.msra.mxu1 %v704_v35  ;;  %v742_v33 = vld [vmem:[#allocation8 + $0x270] sm:$0xff]  ;;  %v757_v35 = vld [vmem:[#allocation8 + $0x2e8] sm:$0xff] }
  0xc9   :  { %1114 = vmatprep.subr.mxu0 %v687_v36  ;;  %1149 = vmatprep.subr.mxu1 %v719_v37  ;;  %v774_v34 = vld [vmem:[#allocation8 + $0x370] sm:$0xff]  ;;  %v789_v36 = vld [vmem:[#allocation8 + $0x3e8] sm:$0xff] }
  0xca   :  { %1115 = vmatpush3.msra.mxu0 %v671_v38  ;;  %1150 = vmatpush3.msra.mxu1 %v703_v39  ;;  %v741_v37 = vld [vmem:[#allocation8 + $0x268] sm:$0xff]  ;;  %v756_v39 = vld [vmem:[#allocation8 + $0x2e0] sm:$0xff] }
  0xcb   :  { %1116 = vmatprep.subr.mxu0 %v686_v40  ;;  %1151 = vmatprep.subr.mxu1 %v718_v41  ;;  %v773_v38 = vld [vmem:[#allocation8 + $0x368] sm:$0xff]  ;;  %v788_v40 = vld [vmem:[#allocation8 + $0x3e0] sm:$0xff] }
  0xcc   :  { %1117 = vmatpush3.msra.mxu0 %v670_v42  ;;  %1152 = vmatpush3.msra.mxu1 %v702_v43  ;;  %v740_v41 = vld [vmem:[#allocation8 + $0x260] sm:$0xff]  ;;  %v755_v43 = vld [vmem:[#allocation8 + $0x2d8] sm:$0xff] }
  0xcd   :  { %1118 = vmatprep.subr.mxu0 %v685_v44  ;;  %1153 = vmatprep.subr.mxu1 %v717_v45  ;;  %v772_v42 = vld [vmem:[#allocation8 + $0x360] sm:$0xff]  ;;  %v787_v44 = vld [vmem:[#allocation8 + $0x3d8] sm:$0xff] }
  0xce   :  { %1119 = vmatpush3.msra.mxu0 %v669_v46  ;;  %1154 = vmatpush3.msra.mxu1 %v701_v47  ;;  %v739_v45 = vld [vmem:[#allocation8 + $0x258] sm:$0xff]  ;;  %v754_v47 = vld [vmem:[#allocation8 + $0x2d0] sm:$0xff] }
  0xcf   :  { %1120 = vmatprep.subr.mxu0 %v684_v48  ;;  %1155 = vmatprep.subr.mxu1 %v716_v49  ;;  %v771_v46 = vld [vmem:[#allocation8 + $0x358] sm:$0xff]  ;;  %v786_v48 = vld [vmem:[#allocation8 + $0x3d0] sm:$0xff] }
  0xd0   :  { %1121 = vmatpush3.msra.mxu0 %v668_v50  ;;  %1156 = vmatpush3.msra.mxu1 %v700_v51  ;;  %v738_v49 = vld [vmem:[#allocation8 + $0x250] sm:$0xff]  ;;  %v753_v51 = vld [vmem:[#allocation8 + $0x2c8] sm:$0xff] }
  0xd1   :  { %1122 = vmatprep.subr.mxu0 %v683_v52  ;;  %1157 = vmatprep.subr.mxu1 %v715_v53  ;;  %v770_v50 = vld [vmem:[#allocation8 + $0x350] sm:$0xff]  ;;  %v785_v52 = vld [vmem:[#allocation8 + $0x3c8] sm:$0xff] }
  0xd2   :  { %1123 = vmatpush3.msra.mxu0 %v667_v54  ;;  %1158 = vmatpush3.msra.mxu1 %v699_v55  ;;  %v737_v53 = vld [vmem:[#allocation8 + $0x248] sm:$0xff]  ;;  %v752_v55 = vld [vmem:[#allocation8 + $0x2c0] sm:$0xff] }
  0xd3   :  { %1124 = vmatprep.subr.mxu0 %v682_v56  ;;  %1159 = vmatprep.subr.mxu1 %v714_v57  ;;  %v769_v54 = vld [vmem:[#allocation8 + $0x348] sm:$0xff]  ;;  %v784_v56 = vld [vmem:[#allocation8 + $0x3c0] sm:$0xff] }
  0xd4   :  { %1125 = vmatpush3.msra.mxu0 %v666_v58  ;;  %1160 = vmatpush3.msra.mxu1 %v698_v59  ;;  %v736_v57 = vld [vmem:[#allocation8 + $0x240] sm:$0xff]  ;;  %v751_v59 = vld [vmem:[#allocation8 + $0x2b8] sm:$0xff] }
  0xd5   :  { %1126 = vmatprep.subr.mxu0 %v681_v60  ;;  %1161 = vmatprep.subr.mxu1 %v713_v61  ;;  %v768_v58 = vld [vmem:[#allocation8 + $0x340] sm:$0xff]  ;;  %v783_v60 = vld [vmem:[#allocation8 + $0x3b8] sm:$0xff] }
  0xd6   :  { %1127 = vmatpush3.msra.mxu0 %v665_v62  ;;  %1162 = vmatpush3.msra.mxu1 %v697_v0  ;;  %v735_v61 = vld [vmem:[#allocation8 + $0x238] sm:$0xff]  ;;  %v750_v0 = vld [vmem:[#allocation8 + $0x2b0] sm:$0xff] }
  0xd7   :  { %1128 = vmatprep.subr.mxu0 %v680_v2  ;;  %1163 = vmatprep.subr.mxu1 %v712_v3  ;;  %v767_v62 = vld [vmem:[#allocation8 + $0x338] sm:$0xff]  ;;  %v782_v2 = vld [vmem:[#allocation8 + $0x3b0] sm:$0xff] }
  0xd8   :  { %1129 = vmatpush3.msra.mxu0 %v664_v4  ;;  %1164 = vmatpush3.msra.mxu1 %v696_v5  ;;  %v734_v3 = vld [vmem:[#allocation8 + $0x230] sm:$0xff]  ;;  %v749_v5 = vld [vmem:[#allocation8 + $0x2a8] sm:$0xff] }
  0xd9   :  { %1168 = vmatprep.subr.mxu0 %v759_v6  ;;  %1203 = vmatprep.subr.mxu1 %v791_v7  ;;  %v766_v4 = vld [vmem:[#allocation8 + $0x330] sm:$0xff]  ;;  %v781_v6 = vld [vmem:[#allocation8 + $0x3a8] sm:$0xff] }
  0xda   :  { %v733_v7 = vld [vmem:[#allocation8 + $0x228] sm:$0xff] }
 0x136   :  { %v438_v18 = vpop.f32.mrf.mxu0  ;;  %v509_v1 = vpop.f32.mrf.mxu1 }
 0x137   :  { %v510_v19 = vadd.f32 %v509_v1, %v343_v15  ;;  %v439_v20 = vadd.f32 %v438_v18, %v335_v16  ;;  %v747_v15 = vld [vmem:[#allocation8 + $0x298] sm:$0xff]  ;;  %v746_v18 = vld [vmem:[#allocation8 + $0x290] sm:$0xff] }
 0x138   :  { %v440_v21 = vpop.f32.mrf.mxu0  ;;  %v511_v22 = vpop.f32.mrf.mxu1  ;;  %v779_v16 = vld [vmem:[#allocation8 + $0x398] sm:$0xff]  ;;  %v778_v1 = vld [vmem:[#allocation8 + $0x390] sm:$0xff] }
 0x139   :  { %v441_v23 = vadd.f32 %v440_v21, %v339_v63  ;;  %v512_v24 = vadd.f32 %v511_v22, %v347_v17  ;;  %v658_v25 = vmax.f32 %v510_v19, 0.0  ;;  %v656_v28 = vmax.f32 %v439_v20, 0.0  ;;  %v731_v63 = vld [vmem:[#allocation8 + $0x218] sm:$0xff]  ;;  %v730_v19 = vld [vmem:[#allocation8 + $0x210] sm:$0xff]  ;;  %v745_v21 = vld [vmem:[#allocation8 + $0x288] sm:$0xff] }
 0x13a   :  { %v763_v17 = vld [vmem:[#allocation8 + $0x318] sm:$0xff]  ;;  %v762_v20 = vld [vmem:[#allocation8 + $0x310] sm:$0xff]  ;;  %v777_v22 = vld [vmem:[#allocation8 + $0x388] sm:$0xff] }
 0x13b   :  { %v657_v26 = vmax.f32 %v441_v23, 0.0  ;;  %v659_v27 = vmax.f32 %v512_v24, 0.0  ;;  %v729_v23 = vld [vmem:[#allocation8 + $0x208] sm:$0xff] }
 0x13c   :  { %v761_v24 = vld [vmem:[#allocation8 + $0x308] sm:$0xff] }
 0x13d   :  { %863 = vmatprep.mubr.f32.mxu0 %v657_v26  ;;  %933 = vmatprep.mubr.f32.mxu1 %v659_v27  ;;  %v776_v26 = vld [vmem:[#allocation8 + $0x380] sm:$0xff] }
 0x13e   :  { %864 = vmatmul.mubr.f32.vlgmr.msra.gmra.mxu0 %v656_v28  ;;  %934 = vmatmul.mubr.f32.vlgmr.msra.gmra.mxu1 %v658_v25  ;;  %v744_v25 = vld [vmem:[#allocation8 + $0x280] sm:$0xff] }
 0x13f   :  { %1169 = vmatpush3.msra.mxu0 %v743_v29  ;;  %1204 = vmatpush3.msra.mxu1 %v775_v30  ;;  %v728_v27 = vld [vmem:[#allocation8 + $0x200] sm:$0xff]  ;;  %v358_v29 = vsub.s32 6, %v1418_v9  ;;  %v350_v30 = vsub.s32 4, %v1418_v9 }
 0x140   :  { %1170 = vmatprep.subr.mxu0 %v758_v31  ;;  %1205 = vmatprep.subr.mxu1 %v790_v32  ;;  %v760_v28 = vld [vmem:[#allocation8 + $0x300] sm:$0xff]  ;;  %v354_v31 = vsub.s32 5, %v1418_v9  ;;  %v362_v32 = vsub.s32 7, %v1418_v9 }
 0x141   :  { %1171 = vmatpush3.msra.mxu0 %v742_v33  ;;  %1206 = vmatpush3.msra.mxu1 %v774_v34  ;;  %v359_v33 = vrot.slane %v1422_v12, %v358_v29  ;;  %v351_v34 = vrot.slane %v1422_v12, %v350_v30 }
 0x142   :  { %1172 = vmatprep.subr.mxu0 %v757_v35  ;;  %1207 = vmatprep.subr.mxu1 %v789_v36  ;;  %v355_v35 = vrot.slane %v1422_v12, %v354_v31  ;;  %v363_v36 = vrot.slane %v1422_v12, %v362_v32 }
 0x143   :  { %1173 = vmatpush3.msra.mxu0 %v741_v37  ;;  %1208 = vmatpush3.msra.mxu1 %v773_v38 }
 0x144   :  { %1174 = vmatprep.subr.mxu0 %v756_v39  ;;  %1209 = vmatprep.subr.mxu1 %v788_v40 }
 0x145   :  { %1175 = vmatpush3.msra.mxu0 %v740_v41  ;;  %1210 = vmatpush3.msra.mxu1 %v772_v42 }
 0x146   :  { %1176 = vmatprep.subr.mxu0 %v755_v43  ;;  %1211 = vmatprep.subr.mxu1 %v787_v44 }
 0x147   :  { %1177 = vmatpush3.msra.mxu0 %v739_v45  ;;  %1212 = vmatpush3.msra.mxu1 %v771_v46 }
 0x148   :  { %1178 = vmatprep.subr.mxu0 %v754_v47  ;;  %1213 = vmatprep.subr.mxu1 %v786_v48 }
 0x149   :  { %1179 = vmatpush3.msra.mxu0 %v738_v49  ;;  %1214 = vmatpush3.msra.mxu1 %v770_v50 }
 0x14a   :  { %1180 = vmatprep.subr.mxu0 %v753_v51  ;;  %1215 = vmatprep.subr.mxu1 %v785_v52  ;;  %v1097_v51 = vld [vmem:[%s1448_s4] ss:$0 sm:$0xff] }
 0x14b   :  { %1181 = vmatpush3.msra.mxu0 %v737_v53  ;;  %1216 = vmatpush3.msra.mxu1 %v769_v54 }
 0x14c   :  { %1182 = vmatprep.subr.mxu0 %v752_v55  ;;  %1217 = vmatprep.subr.mxu1 %v784_v56 }
 0x14d   :  { %1183 = vmatpush3.msra.mxu0 %v736_v57  ;;  %1218 = vmatpush3.msra.mxu1 %v768_v58 }
 0x14e   :  { %1184 = vmatprep.subr.mxu0 %v751_v59  ;;  %1219 = vmatprep.subr.mxu1 %v783_v60 }
 0x14f   :  { %1185 = vmatpush3.msra.mxu0 %v735_v61  ;;  %1220 = vmatpush3.msra.mxu1 %v767_v62 }
 0x150   :  { %1186 = vmatprep.subr.mxu0 %v750_v0  ;;  %1221 = vmatprep.subr.mxu1 %v782_v2 }
 0x151   :  { %1187 = vmatpush3.msra.mxu0 %v734_v3  ;;  %1222 = vmatpush3.msra.mxu1 %v766_v4 }
 0x152   :  { %1188 = vmatprep.subr.mxu0 %v749_v5  ;;  %1223 = vmatprep.subr.mxu1 %v781_v6 }
 0x153   :  { %1189 = vmatpush3.msra.mxu0 %v733_v7  ;;  %1224 = vmatpush3.msra.mxu1 %v765_v8 }
 0x154   :  { %1190 = vmatprep.subr.mxu0 %v748_v10  ;;  %1225 = vmatprep.subr.mxu1 %v780_v11 }
 0x155   :  { %1191 = vmatpush3.msra.mxu0 %v732_v13  ;;  %1226 = vmatpush3.msra.mxu1 %v764_v14 }
 0x156   :  { %1192 = vmatprep.subr.mxu0 %v747_v15  ;;  %1227 = vmatprep.subr.mxu1 %v779_v16 }
 0x157   :  { %1193 = vmatpush3.msra.mxu0 %v731_v63  ;;  %1228 = vmatpush3.msra.mxu1 %v763_v17 }
 0x158   :  { %1194 = vmatprep.subr.mxu0 %v746_v18  ;;  %1229 = vmatprep.subr.mxu1 %v778_v1 }
 0x159   :  { %1195 = vmatpush3.msra.mxu0 %v730_v19  ;;  %1230 = vmatpush3.msra.mxu1 %v762_v20 }
 0x15a   :  { %1196 = vmatprep.subr.mxu0 %v745_v21  ;;  %1231 = vmatprep.subr.mxu1 %v777_v22 }
 0x15b   :  { %1197 = vmatpush3.msra.mxu0 %v729_v23  ;;  %1232 = vmatpush3.msra.mxu1 %v761_v24 }
 0x15c   :  { %1198 = vmatprep.subr.mxu0 %v744_v25  ;;  %1233 = vmatprep.subr.mxu1 %v776_v26 }
 0x15d   :  { %1199 = vmatpush3.msra.mxu0 %v728_v27  ;;  %1234 = vmatpush3.msra.mxu1 %v760_v28 }
 0x178   :  { %v580_v37 = vpop.f32.mrf.mxu0  ;;  %v651_v38 = vpop.f32.mrf.mxu1 }
 0x179   :  { %v652_v39 = vadd.f32 %v651_v38, %v359_v33  ;;  %v581_v40 = vadd.f32 %v580_v37, %v351_v34 }
 0x17a   :  { %v582_v41 = vpop.f32.mrf.mxu0  ;;  %v653_v42 = vpop.f32.mrf.mxu1 }
 0x17b   :  { %v583_v43 = vadd.f32 %v582_v41, %v355_v35  ;;  %v654_v44 = vadd.f32 %v653_v42, %v363_v36  ;;  %v662_v45 = vmax.f32 %v652_v39, 0.0  ;;  %v660_v9 = vmax.f32 %v581_v40, 0.0 }
 0x17d   :  { %v661_v46 = vmax.f32 %v583_v43, 0.0  ;;  %v663_v47 = vmax.f32 %v654_v44, 0.0 }
 0x17f   :  { %1003 = vmatprep.mubr.f32.mxu0 %v661_v46  ;;  %1073 = vmatprep.mubr.f32.mxu1 %v663_v47 }
 0x180   :  { %1004 = vmatmul.mubr.f32.vlgmr.msra.gmra.mxu0 %v660_v9  ;;  %1074 = vmatmul.mubr.f32.vlgmr.msra.gmra.mxu1 %v662_v45 }
 0x1fe   :  { %v1130_v48 = vpop.f32.mrf.mxu0  ;;  %v1165_v50 = vpop.f32.mrf.mxu1 }
 0x200   :  { %v1131_v49 = vpop.f32.mrf.mxu0  ;;  %v1166_v52 = vpop.f32.mrf.mxu1 }
 0x201   :  { %v1132_v12 = vadd.f32 %v1131_v49, %v1130_v48  ;;  %v1167_v56 = vadd.f32 %v1166_v52, %v1165_v50 }
 0x203   :  { %v866_v53 = vadd.f32 %v1132_v12, %v1097_v51 }
 0x205   :  { %v936_v59 = vadd.f32 %v1167_v56, %v866_v53 }
 0x240   :  { %v1200_v54 = vpop.f32.mrf.mxu0  ;;  %v1235_v55 = vpop.f32.mrf.mxu1 }
 0x242   :  { %v1201_v57 = vpop.f32.mrf.mxu0  ;;  %v1236_v58 = vpop.f32.mrf.mxu1 }
 0x243   :  { %v1202_v60 = vadd.f32 %v1201_v57, %v1200_v54  ;;  %v1237_v62 = vadd.f32 %v1236_v58, %v1235_v55 }
 0x245   :  { %v1006_v61 = vadd.f32 %v1202_v60, %v936_v59 }
 0x247   :  { %v1076_v0 = vadd.f32 %v1237_v62, %v1006_v61 }
 0x249   :  { %1079 = vst [vmem:[#allocation10] sm:$0xff] %v1076_v0 }
 0x24a   :  { %1338 = shalt.err (!%p1335_p10)
}
 0x24b   :  { %1089 = dma.vmem_to_hbm [thread:$0]  %s1087_s16, 128, %s1449_s5, [#allocation4]  }
 0x24c   :  { %1353 = dma.done.wait [#allocation4], 128  }
 0x24d   :  { %1354 = vsyncadd [#allocation4], 4294967168 }
 0x24e   :  { %1093 = vsyncpa [#allocation3], 1 }
 0x24f   :  { %1094 = vsyncpa [#allocation6], 1 }
 0x250   :  { %1095 = vsyncpa [#allocation9], 1 }
 0x251   :  { %1096 = vsyncpa [#allocation4], 1 }

</bundles_post_ra>
